<compile_context>
chip_gen: v5e
topology: v5e:2x2
jax: 0.10.0
libtpu: 0.0.40
codegen_flags: <defaults>
</compile_context>

<pallas_src>
import functools

import jax
import jax.numpy as jnp
from jax import lax
from jax.experimental import pallas as pl
from jax.experimental.pallas import tpu as pltpu

_LANES = 128            # vreg lane width
_MAX_BLOCK_ROWS = 8192  # 4 MiB of f32 per input per grid block
_CHUNK_ROWS = 256       # rows folded per inner-loop step (128 KiB f32)


def _bpr_block_kernel(pos_ref, neg_ref, o_ref, *, gamma, rows_in_last, chunk):
    """Fold one (tm, 128) block of scores into an (8, 128) partial sum."""
    tm = pos_ref.shape[0]
    assert tm % chunk == 0
    nchunks = tm // chunk
    acc0 = jnp.zeros((8, _LANES), jnp.float32)

    def make_fold(masked):
        def fold(j, acc):
            r0 = pl.multiple_of(j * chunk, chunk)
            p = pos_ref[pl.ds(r0, chunk), :].astype(jnp.float32)
            q = neg_ref[pl.ds(r0, chunk), :].astype(jnp.float32)
            # Exact PyTorch math: -log(gamma + sigmoid(pos - neg)).
            val = -jnp.log(gamma + jax.nn.sigmoid(p - q))
            if masked:
                # Row mask against a static bound (no global flat index, so
                # no int32 overflow for any N).
                row = r0 + lax.broadcasted_iota(jnp.int32, (chunk, _LANES), 0)
                val = jnp.where(row < rows_in_last, val, 0.0)
            # (chunk,128) -> (chunk//8, 8, 128): trailing (8,128) tile is kept
            # intact, so the sum over axis 0 is pure VPU adds (no relayout,
            # no cross-lane movement).
            return acc + val.reshape(chunk // 8, 8, _LANES).sum(axis=0)
        return fold

    if rows_in_last == tm:
        # Every row of every block is valid: single unmasked path.
        o_ref[...] = lax.fori_loop(0, nchunks, make_fold(False), acc0)
    else:
        i = pl.program_id(0)
        last = pl.num_programs(0) - 1

        @pl.when(i != last)
        def _():
            o_ref[...] = lax.fori_loop(0, nchunks, make_fold(False), acc0)

        @pl.when(i == last)
        def _():
            # Only the last block can hold invalid rows; chunks entirely past
            # the valid range are skipped (static trip count).
            valid_chunks = (rows_in_last + chunk - 1) // chunk
            o_ref[...] = lax.fori_loop(0, valid_chunks, make_fold(True), acc0)


def bpr_loss(pos_score, neg_score, gamma=1e-10, *,
             max_block_rows=_MAX_BLOCK_ROWS, chunk_rows=_CHUNK_ROWS):
    """JAX/Pallas equivalent of BPRLoss(gamma).forward(pos_score, neg_score)."""
    assert pos_score.shape == neg_score.shape, "pos/neg must have the same shape"

    pos_flat = pos_score.reshape(-1)
    neg_flat = neg_score.reshape(-1)
    n = int(pos_flat.shape[0])
    assert n > 0, "scores must be non-empty"
    gamma = float(gamma)

    rows = n // _LANES          # number of full 128-lane rows
    rem = n - rows * _LANES     # sub-row remainder, < 128 elements

    total = jnp.float32(0.0)

    if rows > 0:
        # Sublane packing of the input dtype: f32 -> 8, bf16/f16 -> 16, 8-bit -> 32.
        itemsize = jnp.dtype(pos_flat.dtype).itemsize
        sub = {4: 8, 2: 16, 1: 32}.get(itemsize, 8)
        assert max_block_rows % sub == 0

        if rem == 0:
            bulk_pos = pos_flat.reshape(rows, _LANES)   # pure reshape, no copy
            bulk_neg = neg_flat.reshape(rows, _LANES)
        else:
            bulk_pos = pos_flat[: rows * _LANES].reshape(rows, _LANES)
            bulk_neg = neg_flat[: rows * _LANES].reshape(rows, _LANES)

        if rows >= max_block_rows:
            # Large input: fixed block size, last block may be partial and is
            # masked in-kernel.  No padding / copying of the bulk at all.
            tm = max_block_rows
            num_blocks = -(-rows // tm)
            rows_in_last = rows - (num_blocks - 1) * tm
        else:
            # Small input: one block covering all rows, padded by at most
            # (sub - 1) rows of zeros (O(KiB)) so the block is tile-aligned.
            tm = ((rows + sub - 1) // sub) * sub
            num_blocks = 1
            rows_in_last = rows
            if tm != rows:
                pad = tm - rows
                bulk_pos = jnp.pad(bulk_pos, ((0, pad), (0, 0)))
                bulk_neg = jnp.pad(bulk_neg, ((0, pad), (0, 0)))

        # Largest sublane-aligned chunk that divides the block.
        chunk = next(c for c in (chunk_rows, 256, 128, 64, 32, 16, 8)
                     if tm % c == 0 and c % sub == 0)

        partials = pl.pallas_call(
            functools.partial(_bpr_block_kernel, gamma=gamma,
                              rows_in_last=rows_in_last, chunk=chunk),
            out_shape=jax.ShapeDtypeStruct((num_blocks * 8, _LANES), jnp.float32),
            grid=(num_blocks,),
            in_specs=[pl.BlockSpec((tm, _LANES), lambda i: (i, 0)),
                      pl.BlockSpec((tm, _LANES), lambda i: (i, 0))],
            out_specs=pl.BlockSpec((8, _LANES), lambda i: (i, 0)),
            compiler_params=pltpu.CompilerParams(
                # Each block writes its own partial tile -> shardable across
                # both TensorCores on v7x (no cross-step accumulator).
                dimension_semantics=("parallel",),
                # 2 inputs x 2 buffers x 4 MiB needs > v5e's 16 MiB default;
                # 32 MiB fits every chip's physical VMEM (incl. v7x's 64 MiB).
                vmem_limit_bytes=32 * 1024 * 1024,
            ),
        )(bulk_pos, bulk_neg)

        total = total + jnp.sum(partials, dtype=jnp.float32)

    if rem > 0:
        # < 128 trailing elements: negligible work, handled in plain JAX.
        p = pos_flat[rows * _LANES:].astype(jnp.float32)
        q = neg_flat[rows * _LANES:].astype(jnp.float32)
        total = total + jnp.sum(-jnp.log(gamma + jax.nn.sigmoid(p - q)))

    # Mean, with 1/N folded into the partial-sum combine.
    return total * jnp.float32(1.0 / n)


if __name__ == "__main__":
    key = jax.random.PRNGKey(0)
    keys = jax.random.split(key, 8)
    gamma = 1e-10

    def reference(p, q):
        return -jnp.log(gamma + jax.nn.sigmoid(p - q)).mean()

    def check(pos, neg, **kw):
        out = jax.block_until_ready(bpr_loss(pos, neg, gamma, **kw))
        exp = reference(pos, neg)
        assert jnp.allclose(out, exp, rtol=1e-5, atol=1e-6), (out, exp, kw)

    # 1) N not a multiple of 128: masked block + plain-JAX sub-row tail.
    n1 = 20 * 128 + 37
    check(jax.random.normal(keys[0], (n1,), jnp.float32),
          jax.random.normal(keys[1], (n1,), jnp.float32))

    # 2) 128-aligned N: zero-copy reshape, fully unmasked fast path.
    n2 = 32 * 128
    check(jax.random.normal(keys[2], (n2,), jnp.float32),
          jax.random.normal(keys[3], (n2,), jnp.float32))

    # 3) Multi-block grid (forced small block): parallel per-block partials.
    n3 = 48 * 128
    check(jax.random.normal(keys[4], (n3,), jnp.float32),
          jax.random.normal(keys[5], (n3,), jnp.float32),
          max_block_rows=16)

    # 4) Multi-block grid with a partial (masked) last block and a sub-row tail.
    n4 = 40 * 128 + 5
    check(jax.random.normal(keys[6], (n4,), jnp.float32),
          jax.random.normal(keys[7], (n4,), jnp.float32),
          max_block_rows=16)

    print("KERNEL_OK")
</pallas_src>

<mosaic_0001>
module attributes {stable_mosaic.version = 11 : i64} {
  func.func @_bpr_block_kernel(%arg0: i32, %arg1: memref<24x128xf32, #tpu.memory_space<vmem>>, %arg2: memref<24x128xf32, #tpu.memory_space<vmem>>, %arg3: memref<8x128xf32, #tpu.memory_space<vmem>>) attributes {dimension_semantics = [#tpu.dimension_semantics<parallel>], iteration_bounds = array<i64: 1>, scalar_prefetch = 0 : i64, scratch_operands = 0 : i64, tpu.core_type = #tpu.core_type<tc>, window_params = [{transform_indices = @transform_0, window_bounds = array<i64: 24, 128>}, {transform_indices = @transform_1, window_bounds = array<i64: 24, 128>}, {transform_indices = @transform_2, window_bounds = array<i64: 8, 128>}]} {
    %cst = arith.constant 0.000000e+00 : f32
    %0 = vector.broadcast %cst : f32 to vector<8x128xf32>
    %c0_i32 = arith.constant 0 : i32
    %1 = arith.cmpi ne, %arg0, %c0_i32 : i32
    %2 = arith.extui %1 : i1 to i32
    %c0_i32_0 = arith.constant 0 : i32
    %3 = arith.cmpi ne, %2, %c0_i32_0 : i32
    scf.if %3 {
      %c0_i32_3 = arith.constant 0 : i32
      %c3_i32 = arith.constant 3 : i32
      %7 = arith.addi %c0_i32_3, %c3_i32 : i32
      %c1_i32 = arith.constant 1 : i32
      %8 = scf.for %arg4 = %c0_i32_3 to %7 step %c1_i32 iter_args(%arg5 = %0) -> (vector<8x128xf32>)  : i32 {
        %c8_i32 = arith.constant 8 : i32
        %10 = arith.muli %arg4, %c8_i32 : i32
        %11 = tpu.assume_multiple %10, 8 : i32
        %12 = arith.index_cast %11 : i32 to index
        %c0_6 = arith.constant 0 : index
        %13 = vector.load %arg1[%12, %c0_6] : memref<24x128xf32, #tpu.memory_space<vmem>>, vector<8x128xf32>
        %14 = arith.index_cast %11 : i32 to index
        %c0_7 = arith.constant 0 : index
        %15 = vector.load %arg2[%14, %c0_7] : memref<24x128xf32, #tpu.memory_space<vmem>>, vector<8x128xf32>
        %16 = arith.subf %13, %15 : vector<8x128xf32>
        %17 = arith.negf %16 : vector<8x128xf32>
        %18 = math.exp %17 : vector<8x128xf32>
        %cst_8 = arith.constant 1.000000e+00 : f32
        %19 = vector.broadcast %cst_8 : f32 to vector<8x128xf32>
        %20 = arith.addf %19, %18 : vector<8x128xf32>
        %21 = arith.divf %19, %20 : vector<8x128xf32>
        %cst_9 = arith.constant 1.000000e-10 : f32
        %22 = vector.broadcast %cst_9 : f32 to vector<8x128xf32>
        %23 = arith.addf %22, %21 : vector<8x128xf32>
        %24 = math.log %23 : vector<8x128xf32>
        %cst_10 = arith.constant 0.000000e+00 : f32
        %25 = vector.broadcast %cst_10 : f32 to vector<8x128xf32>
        %26 = arith.subf %25, %24 : vector<8x128xf32>
        %27 = vector.shape_cast %26 : vector<8x128xf32> to vector<1x8x128xf32>
        %cst_11 = arith.constant dense<0.000000e+00> : vector<8x128xf32>
        %28 = vector.multi_reduction <add>, %27, %cst_11 [0] : vector<1x8x128xf32> to vector<8x128xf32>
        %29 = arith.addf %arg5, %28 : vector<8x128xf32>
        scf.yield %29 : vector<8x128xf32>
      }
      %c3_i32_4 = arith.constant 3 : i32
      %c0 = arith.constant 0 : index
      %c0_5 = arith.constant 0 : index
      %9 = vector.load %arg3[%c0, %c0_5] : memref<8x128xf32, #tpu.memory_space<vmem>>, vector<8x128xf32>
      tpu.vector_store %arg3[%c0, %c0_5], %8 {strides = array<i32>} : memref<8x128xf32, #tpu.memory_space<vmem>>, vector<8x128xf32>,
    } else {
    }
    %c0_i32_1 = arith.constant 0 : i32
    %4 = arith.cmpi eq, %arg0, %c0_i32_1 : i32
    %5 = arith.extui %4 : i1 to i32
    %c0_i32_2 = arith.constant 0 : i32
    %6 = arith.cmpi ne, %5, %c0_i32_2 : i32
    scf.if %6 {
      %c0_i32_3 = arith.constant 0 : i32
      %c3_i32 = arith.constant 3 : i32
      %7 = arith.addi %c0_i32_3, %c3_i32 : i32
      %c1_i32 = arith.constant 1 : i32
      %8 = scf.for %arg4 = %c0_i32_3 to %7 step %c1_i32 iter_args(%arg5 = %0) -> (vector<8x128xf32>)  : i32 {
        %c8_i32 = arith.constant 8 : i32
        %10 = arith.muli %arg4, %c8_i32 : i32
        %11 = tpu.assume_multiple %10, 8 : i32
        %12 = arith.index_cast %11 : i32 to index
        %c0_6 = arith.constant 0 : index
        %13 = vector.load %arg1[%12, %c0_6] : memref<24x128xf32, #tpu.memory_space<vmem>>, vector<8x128xf32>
        %14 = arith.index_cast %11 : i32 to index
        %c0_7 = arith.constant 0 : index
        %15 = vector.load %arg2[%14, %c0_7] : memref<24x128xf32, #tpu.memory_space<vmem>>, vector<8x128xf32>
        %16 = arith.subf %13, %15 : vector<8x128xf32>
        %17 = arith.negf %16 : vector<8x128xf32>
        %18 = math.exp %17 : vector<8x128xf32>
        %cst_8 = arith.constant 1.000000e+00 : f32
        %19 = vector.broadcast %cst_8 : f32 to vector<8x128xf32>
        %20 = arith.addf %19, %18 : vector<8x128xf32>
        %21 = arith.divf %19, %20 : vector<8x128xf32>
        %cst_9 = arith.constant 1.000000e-10 : f32
        %22 = vector.broadcast %cst_9 : f32 to vector<8x128xf32>
        %23 = arith.addf %22, %21 : vector<8x128xf32>
        %24 = math.log %23 : vector<8x128xf32>
        %cst_10 = arith.constant 0.000000e+00 : f32
        %25 = vector.broadcast %cst_10 : f32 to vector<8x128xf32>
        %26 = arith.subf %25, %24 : vector<8x128xf32>
        %27 = tpu.iota {dimensions = array<i32: 0>} : vector<8x128xi32>
        %28 = vector.broadcast %11 : i32 to vector<8x128xi32>
        %29 = arith.addi %28, %27 : vector<8x128xi32>
        %c20_i32 = arith.constant 20 : i32
        %30 = vector.broadcast %c20_i32 : i32 to vector<8x128xi32>
        %31 = arith.cmpi slt, %29, %30 : vector<8x128xi32>
        %cst_11 = arith.constant 0.000000e+00 : f32
        %32 = vector.broadcast %cst_11 : f32 to vector<8x128xf32>
        %33 = arith.select %31, %26, %32 : vector<8x128xi1>, vector<8x128xf32>
        %34 = vector.shape_cast %33 : vector<8x128xf32> to vector<1x8x128xf32>
        %cst_12 = arith.constant dense<0.000000e+00> : vector<8x128xf32>
        %35 = vector.multi_reduction <add>, %34, %cst_12 [0] : vector<1x8x128xf32> to vector<8x128xf32>
        %36 = arith.addf %arg5, %35 : vector<8x128xf32>
        scf.yield %36 : vector<8x128xf32>
      }
      %c3_i32_4 = arith.constant 3 : i32
      %c0 = arith.constant 0 : index
      %c0_5 = arith.constant 0 : index
      %9 = vector.load %arg3[%c0, %c0_5] : memref<8x128xf32, #tpu.memory_space<vmem>>, vector<8x128xf32>
      tpu.vector_store %arg3[%c0, %c0_5], %8 {strides = array<i32>} : memref<8x128xf32, #tpu.memory_space<vmem>>, vector<8x128xf32>,
    } else {
    }
    return
  }
  func.func @transform_0(%arg0: i32) -> (i32, i32) {
    %c0_i32 = arith.constant 0 : i32
    %c0_i32_0 = arith.constant 0 : i32
    return %arg0, %c0_i32 : i32, i32
  }
  func.func @transform_1(%arg0: i32) -> (i32, i32) {
    %c0_i32 = arith.constant 0 : i32
    %c0_i32_0 = arith.constant 0 : i32
    return %arg0, %c0_i32 : i32, i32
  }
  func.func @transform_2(%arg0: i32) -> (i32, i32) {
    %c0_i32 = arith.constant 0 : i32
    %c0_i32_0 = arith.constant 0 : i32
    return %arg0, %c0_i32 : i32, i32
  }
}

</mosaic_0001>

<bundles_post_ra>
// kernel: tpu_custom_call.1
= control target key start
LH: loop header
LB: loop body
LE: loop exit
PB: predicated region body
PF: predicated region fallthrough
CT: control target
= control target key end

     0   :  { %7 = vsyncpa [#allocation3], 0  ;;  %s341_s0 = inlined_call_operand.hbm [shape: f32[24,128], index: 0, kind: input, shape index: {}]   ;;  %s342_s1 = inlined_call_operand.hbm [shape: f32[24,128], index: 1, kind: input, shape index: {}]   ;;  %s343_s2 = inlined_call_operand.hbm [shape: f32[8,128], index: 2, kind: output, shape index: {}]  }
   0x1   :  { %8 = vsyncpa [#allocation6], 0 }
   0x2   :  { %9 = vsyncpa [#allocation4], 0  ;;  %s14_s11 = sshll.u32 %s341_s0, 4  ;;  %s303_s12 = smov [#allocation2]   ;;  %s15_s11 = int_to_ptr.hbm [resolvable:$true] %s14_s11 }
   0x3   :  { %s16_s13 = sshll.u32 %s303_s12, 4  ;;  %s27_s16 = sshll.u32 %s342_s1, 4  ;;  %s17_s13 = int_to_ptr.vmem [resolvable:$true] %s16_s13  ;;  %s28_s16 = int_to_ptr.hbm [resolvable:$true] %s27_s16 }
   0x4   :  { %s304_s17 = smov 128   ;;  %s305_s18 = smov 8  }
   0x5   :  { %22 = dma.hbm_to_vmem [thread:$0]  %s15_s11, 384, %s17_s13, [#allocation3], %s304_s17, %s304_s17, %s305_s18  }
   0x6   :  { %s306_s19 = smov [#allocation5]  }
   0x7   :  { %s29_s20 = sshll.u32 %s306_s19, 4  ;;  %s30_s20 = int_to_ptr.vmem [resolvable:$true] %s29_s20 }
   0x8   :  { %35 = dma.hbm_to_vmem [thread:$0]  %s28_s16, 384, %s30_s20, [#allocation6], %s304_s17, %s304_s17, %s305_s18  }
   0x9   :  { %289 = dma.done.wait [#allocation3], 384  }
   0xa   :  { %290 = vsyncadd [#allocation3], 4294966912 }
   0xb   :  { %291 = dma.done.wait [#allocation6], 384  }
   0xc   :  { %292 = vsyncadd [#allocation6], 4294966912  ;;  %v295_v0 = vmov 0.0   ;;  %s329_s0 = smov 0  }
   0xd LB: > { %s180_s1 = sshll.u32 %s301_s0, 3  ;;  %v127_v16 = vlaneseq  ;;  %s96_s0 = sadd.s32 1, %s301_s0   ;;  %s301_s0 = sphi %s329_s0, %s96_s0   ;;  %v297_v0 = vphi %v295_v0, %v296_v0  }
   0xe   : > { %s99_s21 = scalar_lea.vmem [#allocation2], %s180_s1  ;;  %s101_s22 = scalar_lea.vmem [#allocation5], %s180_s1  ;;  %v129_v20 = vstv %s180_s1 }
   0xf   : > { %v100_v1 = vld [vmem:[%s99_s21] sm:$0xff]  ;;  %v128_v19 = vshrl.u32 %v127_v16, 7  ;;  %p93_p0 = scmp.ge.s32.totalorder %s96_s0, 3  }
  0x10   : > { %v102_v2 = vld [vmem:[%s101_s22] sm:$0xff]  ;;  %s143_s25 = sshll.u32 (%p93_p0), %s343_s2, 4  ;;  %s307_s26 = smov (%p93_p0), [#allocation7]   ;;  %s144_s25 = int_to_ptr.hbm [resolvable:$true] %s143_s25 }
  0x11   : > { %v103_v3 = vsub.f32 %v100_v1, %v102_v2  ;;  %v130_v21 = vadd.s32 %v129_v20, %v128_v19  ;;  %s141_s27 = sshll.u32 (%p93_p0), %s307_s26, 4  ;;  %s142_s27 = int_to_ptr.vmem [resolvable:$true] %s141_s27 }
  0x13   : > { %v181_v4 = vmul.f32 -1.442695, %v103_v3  ;;  %vm131_vm4 = vcmp.lt.s32.totalorder %v130_v21, 20 }
  0x15   : > { %203 = vpow2.f32 %v181_v4 }
  0x1b   : > { %v204_v5 = vpop.eup %203 }
  0x1c   : > { %v107_v6 = vadd.f32 1.0, %v204_v5 }
  0x1e   : > { %205 = vrcp.f32 %v107_v6  ;;  %v119_v9 = vand.u32 2147483648, %v107_v6  ;;  %vm113_vm0 = vweird.f32 %v107_v6  ;;  %v117_v11 = vand.u32 2147483647, %v107_v6 }
  0x20   : > { %v120_v13 = vor.u32 1.1754944e-38, %v119_v9  ;;  %vm118_vm3 = vcmp.eq.f32.partialorder %v117_v11, 8.507059e+37 }
  0x24   : > { %v206_v7 = vpop.eup %205 }
  0x25   : > { %v109_v8 = vmul.f32 %v206_v7, %v107_v6  ;;  %vm114_vm1 = vweird.f32 %v206_v7 }
  0x26   : > { %vm115_vm2 = vmor %vm113_vm0, %vm114_vm1 }
  0x27   : > { %v110_v10 = vsub.f32 1.0, %v109_v8 }
  0x29   : > { %v111_v12 = vmul.f32 %v206_v7, %v110_v10 }
  0x2b   : > { %v112_v14 = vadd.f32 %v206_v7, %v111_v12 }
  0x2d   : > { %v116_v15 = vsel %vm115_vm2, %v206_v7, %v112_v14 }
  0x2e   : > { %v121_v17 = vsel %vm118_vm3, %v120_v13, %v116_v15 }
  0x2f   : > { %v123_v18 = vadd.f32 1e-10, %v121_v17 }
  0x31   : > { %207 = vlog2.f32 %v123_v18 }
  0x37   : > { %v208_v22 = vpop.eup %207 }
  0x38   : > { %v125_v23 = vmul.f32 0.6931472, %v208_v22 }
  0x3a   : > { %v126_v24 = vsub.f32 0.0, %v125_v23 }
  0x3b   :  { %95 = sbr.rel (!%p93_p0) target bundleno = 13 (0xd), region = 73 }
  0x3c   : > { %v132_v25 = vsel %vm131_vm4, %v126_v24, 0.0 }
  0x3d   : > { %v134_v26 = vadd.f32 %v297_v0, %v132_v25  }
  0x3f   : > { %v296_v0 = vmov %v134_v26   ;;  %135 = vst [vmem:[#allocation7] sm:$0xff] (%p93_p0), %v134_v26 }
  0x40   :  { %146 = dma.vmem_to_hbm [thread:$0]  %s142_s27, 128, %s144_s25, [#allocation4]  }
  0x41   :  { %293 = dma.done.wait [#allocation4], 128  }
  0x42   :  { %294 = vsyncadd [#allocation4], 4294967168 }
  0x43   :  { %151 = vsyncpa [#allocation3], 1 }
  0x44   :  { %152 = vsyncpa [#allocation6], 1 }
  0x45   :  { %153 = vsyncpa [#allocation4], 1 }

</bundles_post_ra>
